<compile_context>
chip_gen: v7x
topology: tpu7x:2x2x1
jax: 0.10.0
libtpu: 0.0.40
codegen_flags: <defaults>
</compile_context>

<pallas_src>
import functools

import jax
import jax.numpy as jnp
import numpy as np
from jax.experimental import pallas as pl
from jax.experimental.pallas import tpu as pltpu


def make_positional_encoding(max_len, d_model, dtype=jnp.float32):
    """Deterministic sinusoidal PE buffer, shape (1, max_len, d_model)."""
    position = jnp.arange(max_len, dtype=jnp.float32)[:, None]          # (L, 1)
    div_term = jnp.exp(
        jnp.arange(0, d_model, 2, dtype=jnp.float32)
        * (-np.log(10000.0) / d_model)
    )                                                                   # (D/2,)
    pe = jnp.zeros((max_len, d_model), dtype=jnp.float32)
    pe = pe.at[:, 0::2].set(jnp.sin(position * div_term))
    pe = pe.at[:, 1::2].set(jnp.cos(position * div_term))
    return pe[None].astype(dtype)                                       # (1, L, D)


# ---------------------------------------------------------------------------
# Kernels (operate on lane-dense 2D tiles)
# ---------------------------------------------------------------------------

def _pe_add_kernel(x_ref, pe_ref, o_ref):
    # x_ref: (br, bc), pe_ref: (1, bc) -> broadcast add over rows.
    o_ref[...] = x_ref[...] + pe_ref[...]


def _pe_add_dropout_kernel(x_ref, pe_ref, u_ref, o_ref, *, p):
    # Inverted dropout: keep with prob (1-p), scale kept values by 1/(1-p).
    y = x_ref[...] + pe_ref[...]
    scale = jnp.asarray(1.0 / (1.0 - p), dtype=y.dtype)
    keep = u_ref[...] >= jnp.asarray(p, dtype=u_ref.dtype)
    o_ref[...] = jnp.where(keep, y * scale, jnp.zeros_like(y))


# ---------------------------------------------------------------------------
# Wrapper
# ---------------------------------------------------------------------------

def _pick_tile(n, base, max_tile):
    """Largest multiple of `base` that divides n and is <= max_tile, else n."""
    if n <= max_tile:
        return n
    t = (max_tile // base) * base
    while t >= base:
        if n % t == 0:
            return t
        t -= base
    return n


def positional_encoding_forward(x, pe, *, p=0.1, training=False, rng_key=None):
    """Forward pass: x + pe[:, :seq_len, :], then dropout.

    x:  (B, S, D)
    pe: (1, max_len, D) buffer, max_len >= S
    """
    B, S, D = x.shape
    N = S * D

    if training and p >= 1.0:
        # nn.Dropout(p=1.0) zeros everything.
        return jnp.zeros_like(x)

    # Tiny wrapper-side prep: slice the needed rows of the PE table, cast to
    # x.dtype (keeps only one operand width in the kernel), flatten lane-dense.
    pe_row = pe[:, :S, :].reshape(1, N).astype(x.dtype)
    x2 = x.reshape(B, N)

    # Large lane-dense tiles; sizes chosen to stay well inside scoped VMEM on
    # v5e/v6e/v7x even with double buffering (<= ~2 MiB per f32 tile).
    br = _pick_tile(B, 8, 256)
    bc = _pick_tile(N, 128, 2048)
    grid = (B // br, N // bc)

    common = dict(
        out_shape=jax.ShapeDtypeStruct((B, N), x.dtype),
        grid=grid,
        out_specs=pl.BlockSpec((br, bc), lambda i, j: (i, j)),
        compiler_params=pltpu.CompilerParams(
            dimension_semantics=("parallel", "parallel")
        ),
    )

    if training and p > 0.0:
        if rng_key is None:
            rng_key = jax.random.PRNGKey(0)
        u = jax.random.uniform(rng_key, (B, N), dtype=jnp.float32)
        out2 = pl.pallas_call(
            functools.partial(_pe_add_dropout_kernel, p=p),
            in_specs=[
                pl.BlockSpec((br, bc), lambda i, j: (i, j)),   # x
                pl.BlockSpec((1, bc), lambda i, j: (0, j)),    # pe (shared row)
                pl.BlockSpec((br, bc), lambda i, j: (i, j)),   # uniform randoms
            ],
            **common,
        )(x2, pe_row, u)
    else:
        out2 = pl.pallas_call(
            _pe_add_kernel,
            in_specs=[
                pl.BlockSpec((br, bc), lambda i, j: (i, j)),   # x
                pl.BlockSpec((1, bc), lambda i, j: (0, j)),    # pe (shared row)
            ],
            **common,
        )(x2, pe_row)

    return out2.reshape(B, S, D)


# ---------------------------------------------------------------------------
# Demo / self-test
# ---------------------------------------------------------------------------

if __name__ == "__main__":
    # Small shapes consistent with the module's (batch, seq_len, d_model) input.
    B, S, D = 2, 8, 32
    MAX_LEN = 64
    DROPOUT_P = 0.1

    key = jax.random.PRNGKey(0)
    kx, kdrop = jax.random.split(key)
    x = jax.random.normal(kx, (B, S, D), dtype=jnp.float32)

    pe = make_positional_encoding(MAX_LEN, D, dtype=jnp.float32)
    pe_s = pe[:, :S, :]

    # Eval-mode forward (dropout is identity) — compare against pure-JAX ref.
    out_eval = positional_encoding_forward(x, pe, p=DROPOUT_P, training=False)
    out_eval = jax.block_until_ready(out_eval)
    ref_eval = x + pe_s
    assert out_eval.shape == (B, S, D)
    assert jnp.allclose(out_eval, ref_eval, atol=1e-6, rtol=1e-6), \
        "eval mismatch vs reference"

    # Training-mode forward — deterministic given the key; check against a
    # pure-JAX reference built from the same uniform draw.
    out_train = positional_encoding_forward(
        x, pe, p=DROPOUT_P, training=True, rng_key=kdrop
    )
    out_train = jax.block_until_ready(out_train)
    u_ref = jax.random.uniform(kdrop, (B, S * D), dtype=jnp.float32).reshape(B, S, D)
    keep_ref = u_ref >= DROPOUT_P
    ref_train = jnp.where(keep_ref, (x + pe_s) / (1.0 - DROPOUT_P), 0.0)
    assert out_train.shape == (B, S, D)
    assert jnp.allclose(out_train, ref_train, atol=1e-6, rtol=1e-6), \
        "train mismatch vs reference"

    print("KERNEL_OK")
</pallas_src>

<mosaic_0001>
module attributes {stable_mosaic.version = 11 : i64} {
  func.func @_pe_add_kernel(%arg0: i32, %arg1: i32, %arg2: memref<2x256xf32, #tpu.memory_space<vmem>>, %arg3: memref<1x256xf32, #tpu.memory_space<vmem>>, %arg4: memref<2x256xf32, #tpu.memory_space<vmem>>) attributes {dimension_semantics = [#tpu.dimension_semantics<parallel>, #tpu.dimension_semantics<parallel>], iteration_bounds = array<i64: 1, 1>, scalar_prefetch = 0 : i64, scratch_operands = 0 : i64, tpu.core_type = #tpu.core_type<tc>, window_params = [{transform_indices = @transform_0, window_bounds = array<i64: 2, 256>}, {transform_indices = @transform_1, window_bounds = array<i64: 1, 256>}, {transform_indices = @transform_2, window_bounds = array<i64: 2, 256>}]} {
    %c0 = arith.constant 0 : index
    %c0_0 = arith.constant 0 : index
    %0 = vector.load %arg2[%c0, %c0_0] : memref<2x256xf32, #tpu.memory_space<vmem>>, vector<2x256xf32>
    %c0_1 = arith.constant 0 : index
    %c0_2 = arith.constant 0 : index
    %1 = vector.load %arg3[%c0_1, %c0_2] : memref<1x256xf32, #tpu.memory_space<vmem>>, vector<1x256xf32>
    %2 = vector.broadcast %1 : vector<1x256xf32> to vector<2x256xf32>
    %3 = arith.addf %0, %2 : vector<2x256xf32>
    %c0_3 = arith.constant 0 : index
    %c0_4 = arith.constant 0 : index
    %4 = vector.load %arg4[%c0_3, %c0_4] : memref<2x256xf32, #tpu.memory_space<vmem>>, vector<2x256xf32>
    tpu.vector_store %arg4[%c0_3, %c0_4], %3 {strides = array<i32>} : memref<2x256xf32, #tpu.memory_space<vmem>>, vector<2x256xf32>,
    return
  }
  func.func @transform_0(%arg0: i32, %arg1: i32) -> (i32, i32) {
    %c0_i32 = arith.constant 0 : i32
    return %arg0, %arg1 : i32, i32
  }
  func.func @transform_1(%arg0: i32, %arg1: i32) -> (i32, i32) {
    %c0_i32 = arith.constant 0 : i32
    %c0_i32_0 = arith.constant 0 : i32
    return %c0_i32, %arg1 : i32, i32
  }
  func.func @transform_2(%arg0: i32, %arg1: i32) -> (i32, i32) {
    %c0_i32 = arith.constant 0 : i32
    return %arg0, %arg1 : i32, i32
  }
}

</mosaic_0001>

<bundles_post_ra>
// kernel: tpu_custom_call.1
= control target key start
LH: loop header
LB: loop body
LE: loop exit
PB: predicated region body
PF: predicated region fallthrough
CT: control target
= control target key end

     0   :  { %7 = vsyncpa [#allocation3], 0  ;;  %s157_s0 = inlined_call_operand.hbm [shape: f32[2,256], index: 0, kind: input, shape index: {}]   ;;  %s158_s1 = inlined_call_operand.vmem [shape: f32[1,256], index: 1, kind: input, shape index: {}]   ;;  %s159_s2 = inlined_call_operand.hbm [shape: f32[2,256], index: 2, kind: output, shape index: {}]  }
   0x1   :  { %8 = vsyncpa [#allocation4], 0  ;;  %s112_s9 = smov [#allocation2]   ;;  %s64_s13 = scalar_lea.hbm %s157_s0, 64 }
   0x2   :  { %s15_s10 = sshll.u32 %s112_s9, 4  ;;  %p65_p0 = scmp.ne.s32.totalorder %s157_s0, %s64_s13  ;;  %s16_s10 = int_to_ptr.vmem [resolvable:$true] %s15_s10 }
   0x3   :  { %p68_p1 = scmp.lt.u32.totalorder %s64_s13, %s157_s0 }
   0x5   :  { %p70_p2 = pnand %p68_p1, %p65_p0 }
   0x7   :  { %73 = shalt.err (!%p70_p2)
}
   0x8   :  { %s74_s18 = scalar_lea.vmem %s16_s10, 64  ;;  %p79_p4 = scmp.lt.s32.totalorder %s16_s10, %s16_s10 }
   0x9   :  { %p75_p3 = scmp.ne.s32.totalorder %s16_s10, %s74_s18  ;;  %p80_p5 = scmp.lt.s32.totalorder %s74_s18, %s74_s18 }
   0xb   :  { %p81_p6 = por %p80_p5, %p79_p4 }
   0xd   :  { %p82_p7 = pnand %p81_p6, %p75_p3 }
   0xf   :  { %85 = shalt.err (!%p82_p7)
}
  0x10   :  { %18 = dma.hbm_to_vmem [thread:$0]  %s157_s0, 64, %s16_s10, [#allocation3]  }
  0x11   :  { %108 = dma.done.wait [#allocation3], 64  }
  0x12   :  { %109 = vsyncadd [#allocation3], 4294967232  ;;  %v27_v0 = vlaneseq  ;;  %v113_v1 = vmov 1983009808   ;;  %v25_v7 = vld [vmem:[%s158_s1] sm:$0x3] }
  0x13   :  { %v37_v2 = vunpack.c.l.s4 %v113_v1  ;;  %v24_v12 = vld [vmem:[#allocation2] sm:$0xf]  ;;  %s114_s23 = smov [#allocation5]  }
  0x14   :  { %v28_v3 = vshrl.u32 %v27_v0, 7  ;;  %s52_s0 = sshll.u32 %s114_s23, 4  ;;  %s53_s0 = int_to_ptr.vmem [resolvable:$true] %s52_s0 }
  0x15   :  { %v38_v6 = vunpack.c.0.s8 %v37_v2  ;;  %s86_s24 = scalar_lea.vmem %s53_s0, 64  ;;  %p91_p9 = scmp.lt.s32.totalorder %s53_s0, %s53_s0 }
  0x16   :  { %v29_v4 = vsub.s32 0, %v28_v3  ;;  %v33_v5 = vsub.s32 1, %v28_v3  ;;  %p87_p8 = scmp.ne.s32.totalorder %s53_s0, %s86_s24  ;;  %p92_p10 = scmp.lt.s32.totalorder %s86_s24, %s86_s24 }
  0x17   :  { %v41_v10 = vsub.s32 %v38_v6, %v28_v3 }
  0x18   :  { %v30_v8 = vrot.slane %v25_v7, %v29_v4  ;;  %v34_v9 = vrot.slane %v25_v7, %v33_v5  ;;  %p93_p11 = por %p92_p10, %p91_p9 }
  0x1a   :  { %v35_v11 = vcombine.low %v30_v8, %v34_v9  ;;  %p94_p12 = pnand %p93_p11, %p87_p8 }
  0x1c   :  { %v42_v13 = vrot.slane %v35_v11, %v41_v10 }
  0x1e   :  { %v44_v14 = vadd.f32 %v42_v13, %v24_v12 }
  0x20   :  { %45 = vst [vmem:[#allocation5] sm:$0xf] %v44_v14 }
  0x21   :  { %97 = shalt.err (!%p94_p12)
}
  0x22   :  { %s98_s26 = scalar_lea.hbm %s159_s2, 64 }
  0x23   :  { %p99_p13 = scmp.ne.s32.totalorder %s159_s2, %s98_s26  ;;  %p102_p0 = scmp.lt.u32.totalorder %s98_s26, %s159_s2 }
  0x25   :  { %p104_p1 = pnand %p102_p0, %p99_p13 }
  0x27   :  { %107 = shalt.err (!%p104_p1)
}
  0x28   :  { %55 = dma.vmem_to_hbm [thread:$0]  %s53_s0, 64, %s159_s2, [#allocation4]  }
  0x29   :  { %110 = dma.done.wait [#allocation4], 64  }
  0x2a   :  { %111 = vsyncadd [#allocation4], 4294967232 }
  0x2b   :  { %59 = vsyncpa [#allocation3], 1 }
  0x2c   :  { %60 = vsyncpa [#allocation4], 1 }

</bundles_post_ra>
